<compile_context>
chip_gen: v7x
topology: tpu7x:2x2x1
jax: 0.10.0
libtpu: 0.0.40
codegen_flags: <defaults>
</compile_context>

<pallas_src>
import functools

import jax
import jax.numpy as jnp
from jax import lax
from jax.experimental import pallas as pl
from jax.experimental.pallas import tpu as pltpu


def _attention_kernel(q_ref, k_ref, v_ref,
                      wq_ref, bq_ref, wk_ref, bk_ref, wv_ref, bv_ref,
                      o_ref, *, scale):
    # Linear projections (x @ W + b); weights stored pre-transposed as (in, hidden).
    q = jnp.dot(q_ref[...], wq_ref[...], preferred_element_type=jnp.float32) + bq_ref[...]
    k = jnp.dot(k_ref[...], wk_ref[...], preferred_element_type=jnp.float32) + bk_ref[...]
    v = jnp.dot(v_ref[...], wv_ref[...], preferred_element_type=jnp.float32) + bv_ref[...]

    # Scores (block_q, Lk): contract the hidden dims directly (no K transpose copy).
    s = lax.dot_general(q, k, (((1,), (1,)), ((), ())),
                        preferred_element_type=jnp.float32) * scale

    # Numerically-stable softmax over the key axis (matches torch softmax(dim=-1)).
    s_max = jnp.max(s, axis=-1, keepdims=True)
    p = jnp.exp(s - s_max)
    denom = jnp.sum(p, axis=-1, keepdims=True)
    attn = p / denom

    o_ref[...] = jnp.dot(attn, v, preferred_element_type=jnp.float32).astype(o_ref.dtype)


def _pick_block_q(Lq):
    """Largest 8-aligned tile <= 512 that divides Lq; fall back to full Lq."""
    if Lq <= 512:
        return Lq
    for cand in (512, 384, 256, 128, 64, 32, 16, 8):
        if Lq % cand == 0:
            return cand
    return Lq  # odd length: single full-row block (still a legal block spec)


def attention_forward(Q, K, V, params, *, block_q=None):
    """Q: (Lq, Din), K: (Lk, Din), V: (Lk, Din). Returns (Lq, hidden_dim)."""
    Lq, Din = Q.shape
    Lk = K.shape[0]
    H = params["wq"].shape[1]

    if block_q is None:
        block_q = _pick_block_q(Lq)
    assert Lq % block_q == 0 and (block_q % 8 == 0 or block_q == Lq)

    scale = 1.0 / (float(H) ** 0.5)
    grid = (Lq // block_q,)

    def resident(shape):  # whole-array block, pinned in VMEM across grid steps
        return pl.BlockSpec(shape, lambda i: (0, 0))

    return pl.pallas_call(
        functools.partial(_attention_kernel, scale=scale),
        out_shape=jax.ShapeDtypeStruct((Lq, H), jnp.float32),
        grid=grid,
        in_specs=[
            pl.BlockSpec((block_q, Din), lambda i: (i, 0)),   # Q tile (pipelined)
            resident((Lk, Din)),                              # K
            resident((Lk, Din)),                              # V
            resident((Din, H)), resident((1, H)),             # query proj W, b
            resident((Din, H)), resident((1, H)),             # key   proj W, b
            resident((Din, H)), resident((1, H)),             # value proj W, b
        ],
        out_specs=pl.BlockSpec((block_q, H), lambda i: (i, 0)),
        compiler_params=pltpu.CompilerParams(
            dimension_semantics=("parallel",)),
    )(Q, K, V,
      params["wq"], params["bq"],
      params["wk"], params["bk"],
      params["wv"], params["bv"])


def init_params(key, input_dim, hidden_dim):
    """PyTorch nn.Linear default init; weights stored transposed as (in, hidden)."""
    ks = jax.random.split(key, 6)
    bound = 1.0 / jnp.sqrt(jnp.float32(input_dim))

    def u(k, shape):
        return jax.random.uniform(k, shape, jnp.float32, -bound, bound)

    return dict(
        wq=u(ks[0], (input_dim, hidden_dim)), bq=u(ks[1], (1, hidden_dim)),
        wk=u(ks[2], (input_dim, hidden_dim)), bk=u(ks[3], (1, hidden_dim)),
        wv=u(ks[4], (input_dim, hidden_dim)), bv=u(ks[5], (1, hidden_dim)),
    )


if __name__ == "__main__":
    key = jax.random.PRNGKey(0)
    kq, kk, kv, kp = jax.random.split(key, 4)

    Lq, Lk, Din, H = 16, 8, 16, 32   # small shapes; grid of 2 query tiles

    Q = jax.random.normal(kq, (Lq, Din), jnp.float32)
    K = jax.random.normal(kk, (Lk, Din), jnp.float32)
    V = jax.random.normal(kv, (Lk, Din), jnp.float32)
    params = init_params(kp, Din, H)

    out = attention_forward(Q, K, V, params, block_q=8)
    jax.block_until_ready(out)

    # Pure-JAX reference (mirrors the PyTorch forward exactly).
    def reference(Q, K, V, p):
        q = Q @ p["wq"] + p["bq"]
        k = K @ p["wk"] + p["bk"]
        v = V @ p["wv"] + p["bv"]
        s = (q @ k.T) / jnp.sqrt(jnp.float32(H))
        return jax.nn.softmax(s, axis=-1) @ v

    expect = reference(Q, K, V, params)
    assert out.shape == (Lq, H)
    assert jnp.all(jnp.isfinite(out))
    assert jnp.allclose(out, expect, atol=1e-4, rtol=1e-4), \
        float(jnp.max(jnp.abs(out - expect)))
    print("KERNEL_OK")
</pallas_src>

<mosaic_0001>
module attributes {stable_mosaic.version = 11 : i64} {
  func.func @_attention_kernel(%arg0: i32, %arg1: memref<8x16xf32, #tpu.memory_space<vmem>>, %arg2: memref<8x16xf32, #tpu.memory_space<vmem>>, %arg3: memref<8x16xf32, #tpu.memory_space<vmem>>, %arg4: memref<16x32xf32, #tpu.memory_space<vmem>>, %arg5: memref<1x32xf32, #tpu.memory_space<vmem>>, %arg6: memref<16x32xf32, #tpu.memory_space<vmem>>, %arg7: memref<1x32xf32, #tpu.memory_space<vmem>>, %arg8: memref<16x32xf32, #tpu.memory_space<vmem>>, %arg9: memref<1x32xf32, #tpu.memory_space<vmem>>, %arg10: memref<8x32xf32, #tpu.memory_space<vmem>>) attributes {dimension_semantics = [#tpu.dimension_semantics<parallel>], iteration_bounds = array<i64: 2>, scalar_prefetch = 0 : i64, scratch_operands = 0 : i64, tpu.core_type = #tpu.core_type<tc>, window_params = [{transform_indices = @transform_0, window_bounds = array<i64: 8, 16>}, {pipeline_mode = #tpu.pipeline_mode<synchronous>, transform_indices = @transform_1, window_bounds = array<i64: 8, 16>}, {pipeline_mode = #tpu.pipeline_mode<synchronous>, transform_indices = @transform_2, window_bounds = array<i64: 8, 16>}, {pipeline_mode = #tpu.pipeline_mode<synchronous>, transform_indices = @transform_3, window_bounds = array<i64: 16, 32>}, {pipeline_mode = #tpu.pipeline_mode<synchronous>, transform_indices = @transform_4, window_bounds = array<i64: 1, 32>}, {pipeline_mode = #tpu.pipeline_mode<synchronous>, transform_indices = @transform_5, window_bounds = array<i64: 16, 32>}, {pipeline_mode = #tpu.pipeline_mode<synchronous>, transform_indices = @transform_6, window_bounds = array<i64: 1, 32>}, {pipeline_mode = #tpu.pipeline_mode<synchronous>, transform_indices = @transform_7, window_bounds = array<i64: 16, 32>}, {pipeline_mode = #tpu.pipeline_mode<synchronous>, transform_indices = @transform_8, window_bounds = array<i64: 1, 32>}, {transform_indices = @transform_9, window_bounds = array<i64: 8, 32>}]} {
    %c0 = arith.constant 0 : index
    %c0_0 = arith.constant 0 : index
    %0 = vector.load %arg1[%c0, %c0_0] : memref<8x16xf32, #tpu.memory_space<vmem>>, vector<8x16xf32>
    %c0_1 = arith.constant 0 : index
    %c0_2 = arith.constant 0 : index
    %1 = vector.load %arg4[%c0_1, %c0_2] : memref<16x32xf32, #tpu.memory_space<vmem>>, vector<16x32xf32>
    %cst = arith.constant dense<0.000000e+00> : vector<8x32xf32>
    %2 = tpu.matmul %0, %1, %cst {dimension_numbers = #tpu.dot_dimension_numbers<[1], [0], [0], [1], [0, 0, 1, 1], [], []>} : vector<8x16xf32>, vector<16x32xf32>, vector<8x32xf32> -> vector<8x32xf32>
    %c0_3 = arith.constant 0 : index
    %c0_4 = arith.constant 0 : index
    %3 = vector.load %arg5[%c0_3, %c0_4] : memref<1x32xf32, #tpu.memory_space<vmem>>, vector<1x32xf32>
    %4 = vector.broadcast %3 : vector<1x32xf32> to vector<8x32xf32>
    %5 = arith.addf %2, %4 : vector<8x32xf32>
    %c0_5 = arith.constant 0 : index
    %c0_6 = arith.constant 0 : index
    %6 = vector.load %arg2[%c0_5, %c0_6] : memref<8x16xf32, #tpu.memory_space<vmem>>, vector<8x16xf32>
    %c0_7 = arith.constant 0 : index
    %c0_8 = arith.constant 0 : index
    %7 = vector.load %arg6[%c0_7, %c0_8] : memref<16x32xf32, #tpu.memory_space<vmem>>, vector<16x32xf32>
    %cst_9 = arith.constant dense<0.000000e+00> : vector<8x32xf32>
    %8 = tpu.matmul %6, %7, %cst_9 {dimension_numbers = #tpu.dot_dimension_numbers<[1], [0], [0], [1], [0, 0, 1, 1], [], []>} : vector<8x16xf32>, vector<16x32xf32>, vector<8x32xf32> -> vector<8x32xf32>
    %c0_10 = arith.constant 0 : index
    %c0_11 = arith.constant 0 : index
    %9 = vector.load %arg7[%c0_10, %c0_11] : memref<1x32xf32, #tpu.memory_space<vmem>>, vector<1x32xf32>
    %10 = vector.broadcast %9 : vector<1x32xf32> to vector<8x32xf32>
    %11 = arith.addf %8, %10 : vector<8x32xf32>
    %c0_12 = arith.constant 0 : index
    %c0_13 = arith.constant 0 : index
    %12 = vector.load %arg3[%c0_12, %c0_13] : memref<8x16xf32, #tpu.memory_space<vmem>>, vector<8x16xf32>
    %c0_14 = arith.constant 0 : index
    %c0_15 = arith.constant 0 : index
    %13 = vector.load %arg8[%c0_14, %c0_15] : memref<16x32xf32, #tpu.memory_space<vmem>>, vector<16x32xf32>
    %cst_16 = arith.constant dense<0.000000e+00> : vector<8x32xf32>
    %14 = tpu.matmul %12, %13, %cst_16 {dimension_numbers = #tpu.dot_dimension_numbers<[1], [0], [0], [1], [0, 0, 1, 1], [], []>} : vector<8x16xf32>, vector<16x32xf32>, vector<8x32xf32> -> vector<8x32xf32>
    %c0_17 = arith.constant 0 : index
    %c0_18 = arith.constant 0 : index
    %15 = vector.load %arg9[%c0_17, %c0_18] : memref<1x32xf32, #tpu.memory_space<vmem>>, vector<1x32xf32>
    %16 = vector.broadcast %15 : vector<1x32xf32> to vector<8x32xf32>
    %17 = arith.addf %14, %16 : vector<8x32xf32>
    %cst_19 = arith.constant dense<0.000000e+00> : vector<8x8xf32>
    %18 = tpu.matmul %5, %11, %cst_19 {dimension_numbers = #tpu.dot_dimension_numbers<[1], [1], [0], [0], [0, 0, 1, 0], [], []>} : vector<8x32xf32>, vector<8x32xf32>, vector<8x8xf32> -> vector<8x8xf32>
    %cst_20 = arith.constant 0.176776692 : f32
    %19 = vector.broadcast %cst_20 : f32 to vector<8x8xf32>
    %20 = arith.mulf %18, %19 : vector<8x8xf32>
    %cst_21 = arith.constant dense<0xFF800000> : vector<8xf32>
    %21 = vector.multi_reduction <maximumf>, %20, %cst_21 [1] : vector<8x8xf32> to vector<8xf32>
    %22 = vector.shape_cast %21 : vector<8xf32> to vector<8x1xf32>
    %23 = vector.broadcast %22 : vector<8x1xf32> to vector<8x8xf32>
    %24 = arith.subf %20, %23 : vector<8x8xf32>
    %25 = math.exp %24 : vector<8x8xf32>
    %cst_22 = arith.constant dense<0.000000e+00> : vector<8xf32>
    %26 = vector.multi_reduction <add>, %25, %cst_22 [1] : vector<8x8xf32> to vector<8xf32>
    %27 = vector.shape_cast %26 : vector<8xf32> to vector<8x1xf32>
    %28 = vector.broadcast %27 : vector<8x1xf32> to vector<8x8xf32>
    %29 = arith.divf %25, %28 : vector<8x8xf32>
    %cst_23 = arith.constant dense<0.000000e+00> : vector<8x32xf32>
    %30 = tpu.matmul %29, %17, %cst_23 {dimension_numbers = #tpu.dot_dimension_numbers<[1], [0], [0], [1], [0, 0, 1, 1], [], []>} : vector<8x8xf32>, vector<8x32xf32>, vector<8x32xf32> -> vector<8x32xf32>
    %c0_24 = arith.constant 0 : index
    %c0_25 = arith.constant 0 : index
    %31 = vector.load %arg10[%c0_24, %c0_25] : memref<8x32xf32, #tpu.memory_space<vmem>>, vector<8x32xf32>
    tpu.vector_store %arg10[%c0_24, %c0_25], %30 {strides = array<i32>} : memref<8x32xf32, #tpu.memory_space<vmem>>, vector<8x32xf32>,
    return
  }
  func.func @transform_0(%arg0: i32) -> (i32, i32) {
    %c0_i32 = arith.constant 0 : i32
    %c0_i32_0 = arith.constant 0 : i32
    return %arg0, %c0_i32 : i32, i32
  }
  func.func @transform_1(%arg0: i32) -> (i32, i32) {
    %c0_i32 = arith.constant 0 : i32
    %c0_i32_0 = arith.constant 0 : i32
    %c0_i32_1 = arith.constant 0 : i32
    return %c0_i32, %c0_i32_0 : i32, i32
  }
  func.func @transform_2(%arg0: i32) -> (i32, i32) {
    %c0_i32 = arith.constant 0 : i32
    %c0_i32_0 = arith.constant 0 : i32
    %c0_i32_1 = arith.constant 0 : i32
    return %c0_i32, %c0_i32_0 : i32, i32
  }
  func.func @transform_3(%arg0: i32) -> (i32, i32) {
    %c0_i32 = arith.constant 0 : i32
    %c0_i32_0 = arith.constant 0 : i32
    %c0_i32_1 = arith.constant 0 : i32
    return %c0_i32, %c0_i32_0 : i32, i32
  }
  func.func @transform_4(%arg0: i32) -> (i32, i32) {
    %c0_i32 = arith.constant 0 : i32
    %c0_i32_0 = arith.constant 0 : i32
    %c0_i32_1 = arith.constant 0 : i32
    return %c0_i32, %c0_i32_0 : i32, i32
  }
  func.func @transform_5(%arg0: i32) -> (i32, i32) {
    %c0_i32 = arith.constant 0 : i32
    %c0_i32_0 = arith.constant 0 : i32
    %c0_i32_1 = arith.constant 0 : i32
    return %c0_i32, %c0_i32_0 : i32, i32
  }
  func.func @transform_6(%arg0: i32) -> (i32, i32) {
    %c0_i32 = arith.constant 0 : i32
    %c0_i32_0 = arith.constant 0 : i32
    %c0_i32_1 = arith.constant 0 : i32
    return %c0_i32, %c0_i32_0 : i32, i32
  }
  func.func @transform_7(%arg0: i32) -> (i32, i32) {
    %c0_i32 = arith.constant 0 : i32
    %c0_i32_0 = arith.constant 0 : i32
    %c0_i32_1 = arith.constant 0 : i32
    return %c0_i32, %c0_i32_0 : i32, i32
  }
  func.func @transform_8(%arg0: i32) -> (i32, i32) {
    %c0_i32 = arith.constant 0 : i32
    %c0_i32_0 = arith.constant 0 : i32
    %c0_i32_1 = arith.constant 0 : i32
    return %c0_i32, %c0_i32_0 : i32, i32
  }
  func.func @transform_9(%arg0: i32) -> (i32, i32) {
    %c0_i32 = arith.constant 0 : i32
    %c0_i32_0 = arith.constant 0 : i32
    return %arg0, %c0_i32 : i32, i32
  }
}

</mosaic_0001>

<bundles_post_ra>
// kernel: tpu_custom_call.1
= control target key start
LH: loop header
LB: loop body
LE: loop exit
PB: predicated region body
PF: predicated region fallthrough
CT: control target
= control target key end

     0   :  { %s1707_s0 = inlined_call_operand.hbm [shape: f32[16,16], index: 0, kind: input, shape index: {}]   ;;  %s1708_s1 = inlined_call_operand.hbm [shape: f32[8,16], index: 1, kind: input, shape index: {}]   ;;  %s1709_s2 = inlined_call_operand.hbm [shape: f32[8,16], index: 2, kind: input, shape index: {}]   ;;  %s1710_s3 = inlined_call_operand.hbm [shape: f32[16,32], index: 3, kind: input, shape index: {}]   ;;  %s1711_s4 = inlined_call_operand.vmem [shape: f32[1,32], index: 4, kind: input, shape index: {}]   ;;  %s1712_s5 = inlined_call_operand.vmem [shape: f32[16,32], index: 5, kind: input, shape index: {}]   ;;  %s1713_s6 = inlined_call_operand.vmem [shape: f32[1,32], index: 6, kind: input, shape index: {}]   ;;  %s1714_s7 = inlined_call_operand.hbm [shape: f32[16,32], index: 7, kind: input, shape index: {}]   ;;  %s1715_s8 = inlined_call_operand.vmem [shape: f32[1,32], index: 8, kind: input, shape index: {}]   ;;  %s1716_s9 = inlined_call_operand.hbm [shape: f32[16,32], index: 9, kind: output, shape index: {}]  }
   0x1   :  { %1721 = sst [smem:[#allocation16_spill]] %s1708_s1 }
   0x2   :  { %1722 = sst [smem:[#allocation17_spill]] %s1709_s2 }
   0x3   :  { %14 = vsyncpa [#allocation3], 0 }
   0x4   :  { %16 = vsyncpa [#allocation3 + $0x1], 0 }
   0x5   :  { %17 = vsyncpa [#allocation6], 0 }
   0x6   :  { %18 = vsyncpa [#allocation9], 0 }
   0x7   :  { %19 = vsyncpa [#allocation4], 0 }
   0x8   :  { %21 = vsyncpa [#allocation4 + $0x1], 0  ;;  %s1395_s30 = smov 0   ;;  %s1397_s10 = smov 0  }
   0x9   :  { %s1399_s11 = smov 0   ;;  %s1401_s12 = smov 0  }
   0xa LB: > { %s1334_s13 = smov [#allocation5]   ;;  %s1416_s15 = sadd.s32 4294967295, %s1332_s12   ;;  %s1332_s12 = sphi %s1401_s12, %s1746_s12   ;;  %s1328_s11 = sphi %s1399_s11, %s1745_s11   ;;  %s1324_s10 = sphi %s1397_s10, %s1744_s10   ;;  %s1320_s30 = sphi %s1395_s30, %s1743_s30  }
   0xb   : > { %s265_s14 = sshll.u32 %s1334_s13, 4  ;;  %p939_p0 = scmp.ge.s32.totalorder %s1332_s12, 1  ;;  %s266_s14 = int_to_ptr.vmem [resolvable:$true] %s265_s14 }
   0xc   : > { %p1717_p1 = scmp.eq.s32.totalorder %s1416_s15, 0  ;;  %p252_p2 = scmp.lt.s32.totalorder %s1332_s12, 3 }
   0xd   : > { %s1335_s17 = smov [#allocation8]   ;;  %s1336_s20 = smov [#allocation7]  }
   0xe   : > { %p1421_p3 = pnand %p939_p0, %p252_p2  ;;  %s286_s18 = sshll.u32 %s1335_s17, 4  ;;  %s1428_s18 = int_to_ptr.vmem [resolvable:$true] %s286_s18 }
   0xf   : > { %s276_s21 = sshll.u32 %s1336_s20, 4  ;;  %s1725_s1 = sld [smem:[#allocation16_spill]]  ;;  %s1436_s21 = int_to_ptr.vmem [resolvable:$true] %s276_s21 }
  0x10   : > { %s1723_s16 = scalar_select %p1421_p3, 1, 0 }
  0x11   : > { %p1040_p5 = pneg %p1421_p3 }
  0x13   : > { %p1432_p6 = pnand %p1040_p5, %p1717_p1 }
  0x15   : > { %s1116_s24 = scalar_lea.hbm %s1725_s1, 128  ;;  %p1446_p8 = pneg %p1432_p6 }
  0x16   : > { %p1117_p7 = scmp.ne.s32.totalorder %s1725_s1, %s1116_s24  ;;  %p1123_p11 = scmp.lt.u32.totalorder %s1116_s24, %s1725_s1 }
  0x18   : > { %p1119_p9 = pnand %p1446_p8, %p1117_p7 }
  0x1a   : > { %p1120_p10 = pneg %p1119_p9 }
  0x1c   : > { %p1125_p12 = pnand %p1123_p11, %p1120_p10 }
  0x1e   : > { %1128 = shalt.err (!%p1125_p12)
}
  0x1f   : > { %s1129_s13 = scalar_lea.vmem %s266_s14, 128  ;;  %p1137_p5 = scmp.lt.s32.totalorder %s266_s14, %s266_s14 }
  0x20   : > { %p1130_p13 = scmp.ne.s32.totalorder %s266_s14, %s1129_s13  ;;  %p1138_p4 = scmp.lt.s32.totalorder %s1129_s13, %s1129_s13 }
  0x22   : > { %p1132_p0 = pnand %p1130_p13, %p1446_p8  ;;  %p1139_p1 = por %p1138_p4, %p1137_p5 }
  0x24   : > { %p1133_p2 = pneg %p1132_p0 }
  0x26   : > { %p1140_p3 = pnand %p1139_p1, %p1133_p2 }
  0x28   : > { %1143 = shalt.err (!%p1140_p3)
}
  0x29   : > { %1043 = dma.hbm_to_vmem [thread:$0]  (!%p1432_p6), %s1725_s1, 128, %s266_s14, [#allocation6]  }
  0x2a   : > { %s1144_s24 = scalar_lea.hbm %s1710_s3, 256 }
  0x2b   : > { %p1145_p7 = scmp.ne.s32.totalorder %s1710_s3, %s1144_s24  ;;  %p1151_p1 = scmp.lt.u32.totalorder %s1144_s24, %s1710_s3 }
  0x2d   : > { %p1147_p9 = pnand %p1145_p7, %p1446_p8 }
  0x2f   : > { %p1148_p4 = pneg %p1147_p9 }
  0x31   : > { %p1153_p3 = pnand %p1151_p1, %p1148_p4 }
  0x33   : > { %1156 = shalt.err (!%p1153_p3)
}
  0x34   : > { %s1157_s14 = scalar_lea.vmem %s1428_s18, 256  ;;  %p1165_p13 = scmp.lt.s32.totalorder %s1428_s18, %s1428_s18 }
  0x35   : > { %p1158_p10 = scmp.ne.s32.totalorder %s1428_s18, %s1157_s14  ;;  %p1166_p0 = scmp.lt.s32.totalorder %s1157_s14, %s1157_s14 }
  0x37   : > { %p1160_p11 = pnand %p1158_p10, %p1446_p8  ;;  %p1167_p2 = por %p1166_p0, %p1165_p13 }
  0x39   : > { %p1161_p12 = pneg %p1160_p11 }
  0x3b   : > { %p1168_p5 = pnand %p1167_p2, %p1161_p12 }
  0x3d   : > { %1171 = shalt.err (!%p1168_p5)
}
  0x3e   : > { %s1719_s13 = smov 128   ;;  %s1338_s17 = smov 8  }
  0x3f   : > { %1049 = dma.hbm_to_vmem [thread:$0]  (!%p1432_p6), %s1710_s3, 256, %s1428_s18, [#allocation9], %s1719_s13, %s1719_s13, %s1338_s17  }
  0x40   : > { %s1727_s2 = sld [smem:[#allocation17_spill]] }
  0x46   : > { %s1172_s25 = scalar_lea.hbm %s1727_s2, 128 }
  0x47   : > { %p1173_p7 = scmp.ne.s32.totalorder %s1727_s2, %s1172_s25  ;;  %p1179_p1 = scmp.lt.u32.totalorder %s1172_s25, %s1727_s2 }
  0x49   : > { %p1175_p9 = pnand %p1173_p7, %p1446_p8 }
  0x4b   : > { %p1176_p4 = pneg %p1175_p9 }
  0x4d   : > { %p1181_p3 = pnand %p1179_p1, %p1176_p4 }
  0x4f   : > { %1184 = shalt.err (!%p1181_p3)
}
  0x50   : > { %s1185_s18 = scalar_lea.vmem %s1436_s21, 128  ;;  %p1193_p13 = scmp.lt.s32.totalorder %s1436_s21, %s1436_s21 }
  0x51   : > { %p1186_p10 = scmp.ne.s32.totalorder %s1436_s21, %s1185_s18  ;;  %p1194_p0 = scmp.lt.s32.totalorder %s1185_s18, %s1185_s18 }
  0x53   : > { %p1188_p11 = pnand %p1186_p10, %p1446_p8  ;;  %p1195_p2 = por %p1194_p0, %p1193_p13 }
  0x55   : > { %p1189_p12 = pneg %p1188_p11 }
  0x57   : > { %p1196_p5 = pnand %p1195_p2, %p1189_p12 }
  0x59   : > { %1199 = shalt.err (!%p1196_p5)
}
  0x5a   : > { %1046 = dma.hbm_to_vmem [thread:$0]  (!%p1432_p6), %s1727_s2, 128, %s1436_s21, [#allocation6]  }
  0x5b   : > { %s1339_s23 = smov [#allocation10]   ;;  %s1200_s28 = scalar_lea.hbm %s1714_s7, 256 }
  0x5c   : > { %s308_s24 = sshll.u32 %s1339_s23, 4  ;;  %p1201_p7 = scmp.ne.s32.totalorder %s1714_s7, %s1200_s28  ;;  %s309_s24 = int_to_ptr.vmem [resolvable:$true] %s308_s24 }
  0x5d   : > { %p1207_p1 = scmp.lt.u32.totalorder %s1200_s28, %s1714_s7 }
  0x5e   : > { %p1203_p9 = pnand %p1201_p7, %p1446_p8 }
  0x60   : > { %p1204_p4 = pneg %p1203_p9 }
  0x62   : > { %p1209_p3 = pnand %p1207_p1, %p1204_p4 }
  0x64   : > { %1212 = shalt.err (!%p1209_p3)
}
  0x65   : > { %s1213_s21 = scalar_lea.vmem %s309_s24, 256  ;;  %p1221_p13 = scmp.lt.s32.totalorder %s309_s24, %s309_s24 }
  0x66   : > { %p1214_p10 = scmp.ne.s32.totalorder %s309_s24, %s1213_s21  ;;  %p1222_p0 = scmp.lt.s32.totalorder %s1213_s21, %s1213_s21 }
  0x68   : > { %p1216_p11 = pnand %p1214_p10, %p1446_p8  ;;  %p1223_p2 = por %p1222_p0, %p1221_p13 }
  0x6a   : > { %p1217_p12 = pneg %p1216_p11 }
  0x6c   : > { %p1224_p5 = pnand %p1223_p2, %p1217_p12 }
  0x6e   : > { %1227 = shalt.err (!%p1224_p5)
}
  0x6f   : > { %s1728_s20 = smov 128   ;;  %s938_s19 = sadd.s32 4294967294, %s1332_s12  }
  0x70   : > { %1052 = dma.hbm_to_vmem [thread:$0]  (!%p1432_p6), %s1714_s7, 256, %s309_s24, [#allocation9], %s1728_s20, %s1728_s20, %s1338_s17  }
  0x71   : > { %s1534_s27 = sadd.s32 1, %s1332_s12   ;;  %s34_s25 = sadd.s32 1, %s1328_s11 }
  0x72   : > { %s31_s23 = ssub.s32 %s1332_s12, %s1534_s27  ;;  %p41_p7 = scmp.ne.s32.totalorder %s1328_s11, %s1324_s10 }
  0x73   : > { %p32_p8 = scmp.eq.s32.totalorder %s31_s23, 0  ;;  %p42_p9 = scmp.eq.s32.totalorder %s1332_s12, 0 }
  0x74   : > { %p47_p4 = scmp.ne.s32.totalorder %s1324_s10, %s1320_s30  ;;  %p1730_p3 = scmp.eq.s32.totalorder %s1416_s15, 0 }
  0x75   : > { %s1545_s26 = scalar_select %p32_p8, %s1328_s11, %s34_s25  }
  0x76   : > { %p1547_p1 = por %p42_p9, %p41_p7  ;;  %p1553_p6 = por %p1730_p3, %p47_p4 }
  0x77   : > { %p239_p10 = scmp.eq.s32.totalorder %s1416_s15, 1  ;;  %p245_p11 = scmp.eq.s32.totalorder %s938_s19, 1 }
  0x78   : > { %p1065_p12 = scmp.lt.s32.totalorder %s1332_s12, 2  ;;  %s325_s24 = sand.u32 1, %s1328_s11  }
  0x79   : > { %p1560_p13 = por %p239_p10, %p41_p7  ;;  %p1564_p0 = por %p245_p11, %p47_p4 }
  0x7a   : > { %s945_s18 = sshll.u32 %s325_s24, 3  ;;  %s946_s21 = sshll.u32 %s1332_s12, 7 }
  0x7b   : > { %s1732_s29 = scalar_select %p1560_p13, 1, 0 }
  0x7c   : > { %s1733_s14 = scalar_select %p1564_p0, 1, 0 }
  0x7d   : > { %s1572_s22 = scalar_lea.hbm %s1707_s0, %s946_s21  ;;  %s329_s19 = scalar_lea.vmem [#allocation2], %s945_s18 }
  0x7e   : > { %s336_s23 = sshll.u32 %s329_s19, 4  ;;  %p1578_p2 = pnand %p1065_p12, %p1547_p1  ;;  %s1574_s23 = int_to_ptr.vmem [resolvable:$true] %s336_s23 }
  0x7f   : > { %s326_s1 = scalar_lea.sflag [#allocation3], %s325_s24  ;;  %s1228_s2 = scalar_lea.hbm %s1572_s22, 128 }
  0x80   : > { %p1229_p5 = scmp.ne.s32.totalorder %s1572_s22, %s1228_s2  ;;  %p1230_p8 = pneg %p1578_p2 }
  0x81   : > { %s1233_s20 = scalar_lea.hbm %s1707_s0, 256  ;;  %p1234_p4 = scmp.lt.u32.totalorder %s1572_s22, %s1707_s0 }
  0x82   : > { %p1231_p7 = pnand %p1230_p8, %p1229_p5  ;;  %p1235_p1 = scmp.lt.u32.totalorder %s1233_s20, %s1228_s2 }
  0x83   : > { %p1237_p10 = scmp.lt.u32.totalorder %s1228_s2, %s1572_s22 }
  0x84   : > { %p1232_p9 = pneg %p1231_p7  ;;  %p1236_p3 = por %p1235_p1, %p1234_p4 }
  0x86   : > { %p1238_p11 = por %p1237_p10, %p1236_p3 }
  0x88   : > { %p1239_p12 = pnand %p1238_p11, %p1232_p9 }
  0x8a   : > { %1242 = shalt.err (!%p1239_p12)
}
  0x8b   : > { %s1243_s24 = scalar_lea.vmem %s1574_s23, 128  ;;  %s1340_s19 = smov [#allocation2]  }
  0x8c   : > { %p1244_p5 = scmp.ne.s32.totalorder %s1574_s23, %s1243_s24  ;;  %s1248_s18 = sshll.u32 %s1340_s19, 4  ;;  %s1249_s18 = int_to_ptr.vmem [resolvable:$false] %s1248_s18 }
  0x8d   : > { %s1250_s21 = scalar_lea.vmem %s1249_s18, 256  ;;  %p1251_p13 = scmp.lt.s32.totalorder %s1574_s23, %s1249_s18 }
  0x8e   : > { %p1246_p7 = pnand %p1244_p5, %p1230_p8  ;;  %p1252_p4 = scmp.lt.s32.totalorder %s1250_s21, %s1243_s24 }
  0x90   : > { %p1247_p0 = pneg %p1246_p7  ;;  %p1253_p1 = por %p1252_p4, %p1251_p13 }
  0x92   : > { %p1254_p3 = pnand %p1253_p1, %p1247_p0 }
  0x94   : > { %1257 = shalt.err (!%p1254_p3)
}
  0x95   : > { %1056 = dma.hbm_to_vmem [thread:$0]  (!%p1578_p2), %s1572_s22, 128, %s1574_s23, %s326_s1  }
  0x96   : > { %p1735_p9 = scmp.ne.s32.totalorder %s1723_s16, 0 }
  0x97   : > { %s1610_s2 = sand.u32 (!%p1735_p9), 1, %s1324_s10  }
  0x98   : > { %345 = sbr.rel (%p1735_p9) target bundleno = 1145 (0x479), region = 56  ;;  %s948_s20 = sshll.u32 (!%p1735_p9), %s1610_s2, 3 }
  0x99   : > { %s348_s28 = scalar_lea.sflag (!%p1735_p9), [#allocation3], %s1610_s2  ;;  %s351_s13 = scalar_lea.vmem (!%p1735_p9), [#allocation2], %s948_s20 }
  0x9f   : > { %1303 = dma.done.wait (%p1553_p6), %s348_s28, 128  }
  0xa0   : > { %1305 = vsyncadd (%p1553_p6), %s348_s28, 4294967168  ;;  %p1736_p13 = scmp.eq.s32.totalorder %s1416_s15, 0 }
  0xa2   : > { %1307 = dma.done.wait (%p1736_p13), [#allocation6], 256   ;;  %p1737_p0 = pmov %p1736_p13 }
  0xa4   : > { %1309 = vsyncadd (%p1737_p0), [#allocation6], 4294967040  ;;  %p1738_p2 = pmov %p1737_p0 }
  0xa5   : > { %p1739_p8 = pmov %p1737_p0 }
  0xa6   : > { %1311 = dma.done.wait (%p1738_p2), [#allocation9], 512  }
  0xa7   : > { %1313 = vsyncadd (%p1739_p8), [#allocation9], 4294966784  ;;  %v1341_v0 = vmov 0.0|0.0   ;;  %vm1342_vm0 = vmmov 0   ;;  %v1343_v1 = vmov 0.0   ;;  %v487_v2 = vld [vmem:[%s1712_s5] sm:$0xff] }
  0xa8   : > { %1014 = vmatprep.subr.bf16.mxu1 %v1341_v0  ;;  %1011 = vmatprep.subr.bf16.mxu0 %v1341_v0  ;;  %v488_v3 = vld [vmem:[%s1712_s5 + $0x8] sm:$0xff]  ;;  %v403_v4 = vld [vmem:[#allocation8] sm:$0xff]  ;;  %vm412_vm1 = vcmask 130048   ;;  %v486_v8 = vld [vmem:[#allocation5] sm:$0xff]  ;;  %vm652_vm2 = vcmask 261120   ;;  %vm730_vm3 = vcmask 64512  }
  0xa9   : > { %991 = vmatprep.mubr.msk.f32.mxu1 %vm1342_vm0, %v1343_v1  ;;  %984 = vmatprep.mubr.msk.f32.mxu0 %vm1342_vm0, %v1343_v1  ;;  %v1015_v5 = vpack.c.bf16 %v488_v3, %v487_v2  ;;  %v404_v6 = vld [vmem:[#allocation8 + $0x8] sm:$0xff]  ;;  %v956_v10 = vld [vmem:[%s1713_s6] ss:$0 sm:$0xff]  ;;  %v570_v18 = vld [vmem:[#allocation10] sm:$0xff]  ;;  %s964_s28 = sshll.u32 %s1416_s15, 7  ;;  %s817_s23 = scalar_lea.sflag [#allocation4], %s1610_s2 }
  0xaa   : > { %v1012_v7 = vpack.c.bf16 %v404_v6, %v403_v4  ;;  %v402_v9 = vld [vmem:[%s351_s13] sm:$0xff]  ;;  %v571_v19 = vld [vmem:[#allocation10 + $0x8] sm:$0xff]  ;;  %s401_s13 = scalar_lea.vmem [#allocation11], %s948_s20  ;;  %s1662_s22 = scalar_lea.hbm %s1716_s9, %s964_s28 }
  0xab   : > { %1016 = vmatpush3.bf16.msra.mxu1 %v1015_v5  ;;  %v954_v11 = vld [vmem:[%s1711_s4] ss:$0 sm:$0xff]  ;;  %v1018_v20 = vpack.c.bf16 %v571_v19, %v570_v18  ;;  %v569_v21 = vld [vmem:[#allocation7] sm:$0xff]  ;;  %s830_s1 = sshll.u32 %s401_s13, 4  ;;  %p1740_p10 = scmp.ne.s32.totalorder %s1732_s29, 0  ;;  %s1664_s1 = int_to_ptr.vmem [resolvable:$true] %s830_s1 }
  0xac   : > { %1013 = vmatpush3.bf16.msra.mxu0 %v1012_v7  ;;  %1001 = vmatprep.subr.mxu1 %v1343_v1  ;;  %v958_v32 = vld [vmem:[%s1715_s8] ss:$0 sm:$0xff]  ;;  %s1258_s25 = scalar_lea.vmem %s1664_s1, 128  ;;  %s1344_s15 = smov [#allocation11]  }
  0xad   : > { %1017 = vmatprep.subr.bf16.mxu0 %v1341_v0  ;;  %p1259_p6 = scmp.ne.s32.totalorder %s1664_s1, %s1258_s25  ;;  %s1262_s20 = sshll.u32 %s1344_s15, 4  ;;  %s1263_s20 = int_to_ptr.vmem [resolvable:$false] %s1262_s20 }
  0xae   : > { %992 = vmatmul.mubr.msk.f32.vlgmr.msra.gmra.mrb[0].mxu1 %vm412_vm1, %v486_v8  ;;  %s1264_s24 = scalar_lea.vmem %s1263_s20, 256  ;;  %p1265_p5 = scmp.lt.s32.totalorder %s1664_s1, %s1263_s20 }
  0xaf   : > { %985 = vmatmul.mubr.msk.f32.vlgmr.msra.gmra.mrb[0].mxu0 %vm412_vm1, %v402_v9  ;;  %1003 = vmatprep.mubr.msk.f32.mxu1 %vm1342_vm0, %v1343_v1  ;;  %p1260_p11 = pnand %p1259_p6, %p1740_p10  ;;  %p1266_p7 = scmp.lt.s32.totalorder %s1264_s24, %s1258_s25 }
  0xb0   : > { %998 = vmatprep.mubr.msk.f32.mxu0 %vm1342_vm0, %v1343_v1  ;;  %1019 = vmatpush3.bf16.msra.mxu0 %v1018_v20 }
  0xb1   : > { %1006 = vmatprep.subr.mxu0 %v1343_v1  ;;  %p1261_p12 = pneg %p1260_p11  ;;  %p1267_p4 = por %p1266_p7, %p1265_p5 }
  0xb3   : > { %999 = vmatmul.mubr.msk.f32.vlgmr.msra.gmra.mrb[2].mxu0 %vm412_vm1, %v569_v21  ;;  %p1268_p1 = pnand %p1267_p4, %p1261_p12 }
  0xb4   : > { %1008 = vmatprep.mubr.msk.f32.mxu0 %vm1342_vm0, %v1343_v1 }
 0x181   : > { %v565_v12 = vpop.f32.mrb[0].mxu1 }
 0x182   : > { %v566_v13 = vadd.f32 %v956_v10, %v565_v12  ;;  %v993_v14 = vpop.f32.mrb[1].mxu1  ;;  %v482_v15 = vpop.f32.mrb[0].mxu0 }
 0x183   : > { %v483_v16 = vadd.f32 %v954_v11, %v482_v15  ;;  %v986_v17 = vpop.f32.mrb[1].mxu0 }
 0x184   : > { %1002 = vmatpush3.xpose.msk.msra.mxu1 %vm652_vm2, %v566_v13 }
 0x186   : > { %v648_v31 = vpop.f32.mrb[2].mxu0 }
 0x187   : > { %1004 = vmatmul.mubr.msk.f32.vlgmr.msra.gmra.mrb[2].mxu1 %vm652_vm2, %v483_v16  ;;  %v1000_v33 = vpop.f32.mrb[3].mxu0  ;;  %v649_v34 = vadd.f32 %v958_v32, %v648_v31 }
 0x189   : > { %1007 = vmatpush3.msra.mxu0 %v649_v34 }
 0x25a   : > { %v725_v22 = vpop.f32.mrb[2].mxu1 }
 0x25b   : > { %v729_v23 = vmul.f32 0.17677669, %v725_v22  ;;  %v1005_v24 = vpop.f32.mrb[3].mxu1 }
 0x25d   : > { %v731_v25 = vsel %vm730_vm3, %v729_v23, -inf }
 0x25e   : > { %732 = vmax.xlane.f32.xlu0 %v731_v25 }
 0x2eb   : > { %v733_v26 = vpop.xlane.xlu0 %732 }
 0x2ec   : > { %v734_v27 = vsub.f32 %v729_v23, %v733_v26 }
 0x2ee   : > { %v735_v28 = vmul.f32 1.442695, %v734_v27 }
 0x2f0   : > { %1112 = vpow2.f32 %v735_v28 }
 0x2fa   : > { %v1113_v29 = vpop.eup %1112 }
 0x2fb   : > { %v737_v30 = vsel %vm730_vm3, %v1113_v29, 0.0 }
 0x2fc   : > { %738 = vadd.xlane.f32.xlu0 %v737_v30 }
 0x389   : > { %v739_v35 = vpop.xlane.xlu0 %738 }
 0x38a   : > { %1114 = vrcp.f32 %v739_v35 }
 0x394   : > { %v1115_v36 = vpop.eup %1114 }
 0x395   : > { %v741_v37 = vmul.f32 %v1115_v36, %v1113_v29 }
 0x397   : > { %1009 = vmatmul.mubr.msk.f32.vlgmr.msra.gmra.mrb[4].mxu0 %vm730_vm3, %v741_v37 }
 0x46a   : > { %v811_v38 = vpop.f32.mrb[4].mxu0 }
 0x46b   : > { %815 = vst.msk [vmem:[%s401_s13] sm:$0xff] %vm652_vm2, %v811_v38  ;;  %v1010_v39 = vpop.f32.mrb[5].mxu0 }
 0x46c   : > { %1271 = shalt.err (!%p1268_p1)
}
 0x46d   : > { %s1272_s2 = scalar_lea.hbm %s1662_s22, 128  ;;  %s1276_s21 = scalar_lea.hbm %s1716_s9, 256 }
 0x46e   : > { %p1273_p3 = scmp.ne.s32.totalorder %s1662_s22, %s1272_s2  ;;  %p1277_p0 = scmp.lt.u32.totalorder %s1662_s22, %s1716_s9 }
 0x46f   : > { %p1278_p2 = scmp.lt.u32.totalorder %s1276_s21, %s1272_s2  ;;  %p1280_p6 = scmp.lt.u32.totalorder %s1272_s2, %s1662_s22 }
 0x470   : > { %p1274_p9 = pnand %p1273_p3, %p1740_p10 }
 0x471   : > { %p1279_p8 = por %p1278_p2, %p1277_p0 }
 0x472   : > { %p1275_p13 = pneg %p1274_p9 }
 0x473   : > { %p1281_p11 = por %p1280_p6, %p1279_p8 }
 0x475   : > { %p1282_p12 = pnand %p1281_p11, %p1275_p13 }
 0x477   : > { %1285 = shalt.err (!%p1282_p12)
}
 0x478   : > { %1038 = dma.vmem_to_hbm [thread:$0]  (%p1740_p10), %s1664_s1, 128, %s1662_s22, %s817_s23  }
 0x479 PF: > { %s842_s16 = sand.u32 1, %s1320_s30   ;;  %p1741_p5 = scmp.ne.s32.totalorder %s1733_s14, 0 }
 0x47a   : > { %p1742_p7 = scmp.ge.s32.totalorder %s1332_s12, 2  ;;  %s843_s17 = scalar_lea.sflag [#allocation4], %s842_s16 }
 0x47c   : > { %p1058_p4 = pnand %p1742_p7, %p1741_p5 }
 0x47e   : > { %1315 = dma.done.wait (!%p1058_p4), %s843_s17, 128  }
 0x47f   : > { %1317 = vsyncadd (!%p1058_p4), %s843_s17, 4294967168  ;;  %p24_p1 = scmp.ge.s32.totalorder %s1534_s27, 4   ;;  %s1743_s30 = smov %s1324_s10 }
 0x480   : > { %s1744_s10 = smov %s1328_s11  ;;  %s1745_s11 = smov %s1545_s26 }
 0x481   : > { %s1746_s12 = smov %s1534_s27  ;;  %26 = sbr.rel (!%p24_p1) target bundleno = 10 (0xa), region = 117 }
 0x488   :  { %848 = vsyncpa [#allocation3], 1 }
 0x489   :  { %850 = vsyncpa [#allocation3 + $0x1], 1 }
 0x48a   :  { %851 = vsyncpa [#allocation6], 1 }
 0x48b   :  { %852 = vsyncpa [#allocation9], 1 }
 0x48c   :  { %853 = vsyncpa [#allocation4], 1 }
 0x48d   :  { %855 = vsyncpa [#allocation4 + $0x1], 1 }

</bundles_post_ra>
